<compile_context>
chip_gen: v5e
topology: v5e:2x2
jax: 0.10.0
libtpu: 0.0.40
codegen_flags: <defaults>
</compile_context>

<pallas_src>
import functools

import jax
import jax.numpy as jnp
from jax.experimental import pallas as pl
from jax.experimental.pallas import tpu as pltpu


def _rnn_recurrence_kernel(xproj_ref, whh_ref, h0_ref, y_ref, state_ref, *, ts):
    """Sequential tanh recurrence over a block of `ts` timesteps.

    xproj_ref : (ts, tb, hidden)   precomputed x@W_ih^T + b_ih + b_hh
    whh_ref   : (hidden, hidden)   W_hh^T
    h0_ref    : (tb, hidden)       initial hidden state for this batch block
    y_ref     : (ts, tb, hidden)   per-step hidden states (feeds the head)
    state_ref : (tb, hidden)       carried state (constant index_map => VMEM
                                   resident across the seq axis; final value
                                   is the returned RNN state)
    """
    # Initialize the carried state at the first sequence block.
    @pl.when(pl.program_id(1) == 0)
    def _():
        state_ref[...] = h0_ref[...]

    def step(i, h):
        h_new = jnp.tanh(
            xproj_ref[i]
            + jnp.dot(h, whh_ref[...], preferred_element_type=jnp.float32)
        )
        y_ref[i] = h_new
        return h_new

    # Unrolled inner loop: gives the scheduler a visible window to interleave
    # the h@Whh matmul (MXU), tanh (EUP) and the y stores.
    state_ref[...] = jax.lax.fori_loop(0, ts, step, state_ref[...], unroll=True)


def _output_proj_kernel(y_ref, wout_ref, bout_ref, out_ref):
    """Linear head: (ts*batch, hidden) @ (hidden, vocab) + bias.

    Embarrassingly parallel over sequence blocks -- runs outside the
    recurrence so it issues one big lane-dense MXU matmul per tile.
    """
    ts, b, h = y_ref.shape
    y2 = y_ref[...].reshape(ts * b, h)
    out_ref[...] = (
        jnp.dot(y2, wout_ref[...], preferred_element_type=jnp.float32)
        + bout_ref[...]
    )


def rnn_model_forward(X_ids, h0, params, vocab_size, *, ts=8, tb=None):
    """X_ids: (batch, seq) int32.  h0: (1, batch, hidden).  Returns (output, state)."""
    w_ih, w_hh, b_ih, b_hh, w_out, b_out = params
    hidden = w_hh.shape[0]
    batch, seq = X_ids.shape
    if tb is None:
        tb = batch
    assert seq % ts == 0, "seq must be divisible by the seq tile ts"
    assert batch % tb == 0, "batch must be divisible by the batch tile tb"

    # Weight layout: pre-transpose so kernels do plain row-major matmuls.
    wih_t = w_ih.T                    # (vocab,  hidden)
    whh_t = w_hh.T                    # (hidden, hidden)
    wout_t = w_out.T                  # (hidden, vocab)
    bout = b_out[None, :]             # (1, vocab)
    h0_2d = h0[0]                     # (batch, hidden)

    # Glue: F.one_hot(X.T).float() @ W_ih^T selects rows of W_ih^T exactly, so
    # replace the one-hot matmul with a gather (vocab_size x less input DMA,
    # one fewer MXU op per step).  Fold both RNN biases in here as well.
    x_proj = jnp.take(wih_t, X_ids.T, axis=0) + (b_ih + b_hh)[None, None, :]
    # x_proj: (seq, batch, hidden) float32

    # ---- Kernel 1: sequential recurrence (batch parallel, seq arbitrary) ----
    y, state = pl.pallas_call(
        functools.partial(_rnn_recurrence_kernel, ts=ts),
        out_shape=(
            jax.ShapeDtypeStruct((seq, batch, hidden), jnp.float32),
            jax.ShapeDtypeStruct((batch, hidden), jnp.float32),
        ),
        grid_spec=pltpu.PrefetchScalarGridSpec(
            num_scalar_prefetch=0,
            grid=(batch // tb, seq // ts),
            in_specs=[
                pl.BlockSpec((ts, tb, hidden), lambda b, t: (t, b, 0)),
                pl.BlockSpec((hidden, hidden), lambda b, t: (0, 0)),
                pl.BlockSpec((tb, hidden), lambda b, t: (b, 0)),
            ],
            out_specs=[
                pl.BlockSpec((ts, tb, hidden), lambda b, t: (t, b, 0)),
                pl.BlockSpec((tb, hidden), lambda b, t: (b, 0)),
            ],
        ),
        compiler_params=pltpu.CompilerParams(
            # batch blocks are independent -> "parallel" (2 TCs on v7x);
            # seq carries the recurrence -> "arbitrary" (sequential).
            dimension_semantics=("parallel", "arbitrary"),
            vmem_limit_bytes=32 * 1024 * 1024,
        ),
    )(x_proj, whh_t, h0_2d)

    # ---- Kernel 2: Linear head, fully parallel over sequence blocks ----
    output = pl.pallas_call(
        _output_proj_kernel,
        out_shape=jax.ShapeDtypeStruct((seq * batch, vocab_size), jnp.float32),
        grid_spec=pltpu.PrefetchScalarGridSpec(
            num_scalar_prefetch=0,
            grid=(seq // ts,),
            in_specs=[
                pl.BlockSpec((ts, batch, hidden), lambda t: (t, 0, 0)),
                pl.BlockSpec((hidden, vocab_size), lambda t: (0, 0)),
                pl.BlockSpec((1, vocab_size), lambda t: (0, 0)),
            ],
            out_specs=pl.BlockSpec((ts * batch, vocab_size), lambda t: (t, 0)),
        ),
        compiler_params=pltpu.CompilerParams(
            dimension_semantics=("parallel",),
            vmem_limit_bytes=32 * 1024 * 1024,
        ),
    )(y, wout_t, bout)

    return output, state[None]  # state: (1, batch, hidden)


def _reference_forward(X_ids, h0, params, vocab_size):
    """Pure-JAX reference mirroring the PyTorch module.

    Note: one_hot(x).float() @ W_ih^T selects rows of W_ih^T exactly (products
    are 1*w or 0*w), so the mathematically identical gather is used here to
    keep the reference exact like PyTorch f32.
    """
    w_ih, w_hh, b_ih, b_hh, w_out, b_out = params
    x_proj = w_ih.T[X_ids.T]                     # (seq, batch, hidden)
    h = h0[0]

    def step(h, xp_t):
        h_new = jnp.tanh(xp_t + b_ih + h @ w_hh.T + b_hh)
        return h_new, h_new

    h_final, Y = jax.lax.scan(step, h, x_proj)
    out = Y.reshape(-1, Y.shape[-1]) @ w_out.T + b_out
    return out, h_final[None]


if __name__ == "__main__":
    # Small but lane-dense shapes: hidden/vocab multiples of 128, batch >= 8.
    vocab_size = 128
    hidden = 128
    batch = 8
    seq = 32

    key = jax.random.PRNGKey(0)
    k = jax.random.split(key, 7)
    w_ih = 0.1 * jax.random.normal(k[0], (hidden, vocab_size), jnp.float32)
    w_hh = 0.05 * jax.random.normal(k[1], (hidden, hidden), jnp.float32)
    b_ih = 0.1 * jax.random.normal(k[2], (hidden,), jnp.float32)
    b_hh = 0.1 * jax.random.normal(k[3], (hidden,), jnp.float32)
    w_out = 0.1 * jax.random.normal(k[4], (vocab_size, hidden), jnp.float32)
    b_out = 0.1 * jax.random.normal(k[5], (vocab_size,), jnp.float32)
    params = (w_ih, w_hh, b_ih, b_hh, w_out, b_out)

    X_ids = jax.random.randint(k[6], (batch, seq), 0, vocab_size, jnp.int32)
    h0 = jnp.zeros((1, batch, hidden), jnp.float32)  # init_state equivalent

    output, state = rnn_model_forward(X_ids, h0, params, vocab_size, ts=8, tb=batch)
    jax.block_until_ready((output, state))

    ref_out, ref_state = _reference_forward(X_ids, h0, params, vocab_size)
    assert output.shape == (seq * batch, vocab_size)
    assert state.shape == (1, batch, hidden)
    # Tolerance allows for MXU-default vs XLA-default f32 matmul decomposition
    # differences; structural bugs produce O(0.1) errors, far above this.
    assert jnp.allclose(output, ref_out, atol=2e-3, rtol=2e-3), "output mismatch"
    assert jnp.allclose(state, ref_state, atol=2e-3, rtol=2e-3), "state mismatch"

    print("KERNEL_OK")
</pallas_src>

<mosaic_0001>
module attributes {stable_mosaic.version = 11 : i64} {
  func.func @_rnn_recurrence_kernel(%arg0: i32, %arg1: i32, %arg2: memref<8x8x128xf32, #tpu.memory_space<vmem>>, %arg3: memref<128x128xf32, #tpu.memory_space<vmem>>, %arg4: memref<8x128xf32, #tpu.memory_space<vmem>>, %arg5: memref<8x8x128xf32, #tpu.memory_space<vmem>>, %arg6: memref<8x128xf32, #tpu.memory_space<vmem>>) attributes {dimension_semantics = [#tpu.dimension_semantics<parallel>, #tpu.dimension_semantics<arbitrary>], iteration_bounds = array<i64: 1, 4>, scalar_prefetch = 0 : i64, scratch_operands = 0 : i64, tpu.core_type = #tpu.core_type<tc>, window_params = [{transform_indices = @transform_0, window_bounds = array<i64: 8, 8, 128>}, {pipeline_mode = #tpu.pipeline_mode<synchronous>, transform_indices = @transform_1, window_bounds = array<i64: 128, 128>}, {transform_indices = @transform_2, window_bounds = array<i64: 8, 128>}, {transform_indices = @transform_3, window_bounds = array<i64: 8, 8, 128>}, {transform_indices = @transform_4, window_bounds = array<i64: 8, 128>}]} {
    %c0_i32 = arith.constant 0 : i32
    %0 = arith.cmpi eq, %arg1, %c0_i32 : i32
    %1 = arith.extui %0 : i1 to i32
    %c0_i32_0 = arith.constant 0 : i32
    %2 = arith.cmpi ne, %1, %c0_i32_0 : i32
    scf.if %2 {
      %c0_60 = arith.constant 0 : index
      %c0_61 = arith.constant 0 : index
      %93 = vector.load %arg4[%c0_60, %c0_61] : memref<8x128xf32, #tpu.memory_space<vmem>>, vector<8x128xf32>
      %c0_62 = arith.constant 0 : index
      %c0_63 = arith.constant 0 : index
      %94 = vector.load %arg6[%c0_62, %c0_63] : memref<8x128xf32, #tpu.memory_space<vmem>>, vector<8x128xf32>
      tpu.vector_store %arg6[%c0_62, %c0_63], %93 {strides = array<i32>} : memref<8x128xf32, #tpu.memory_space<vmem>>, vector<8x128xf32>,
    } else {
    }
    %c0 = arith.constant 0 : index
    %c0_1 = arith.constant 0 : index
    %3 = vector.load %arg6[%c0, %c0_1] : memref<8x128xf32, #tpu.memory_space<vmem>>, vector<8x128xf32>
    %c0_i32_2 = arith.constant 0 : i32
    %4 = arith.index_cast %c0_i32_2 : i32 to index
    %c0_3 = arith.constant 0 : index
    %c0_4 = arith.constant 0 : index
    %5 = vector.load %arg2[%4, %c0_3, %c0_4] : memref<8x8x128xf32, #tpu.memory_space<vmem>>, vector<1x8x128xf32>
    %6 = vector.shape_cast %5 : vector<1x8x128xf32> to vector<8x128xf32>
    %c0_5 = arith.constant 0 : index
    %c0_6 = arith.constant 0 : index
    %7 = vector.load %arg3[%c0_5, %c0_6] : memref<128x128xf32, #tpu.memory_space<vmem>>, vector<128x128xf32>
    %cst = arith.constant dense<0.000000e+00> : vector<8x128xf32>
    %8 = tpu.matmul %3, %7, %cst {dimension_numbers = #tpu.dot_dimension_numbers<[1], [0], [0], [1], [0, 0, 1, 1], [], []>} : vector<8x128xf32>, vector<128x128xf32>, vector<8x128xf32> -> vector<8x128xf32>
    %9 = arith.addf %6, %8 : vector<8x128xf32>
    %10 = math.tanh %9 : vector<8x128xf32>
    %11 = arith.index_cast %c0_i32_2 : i32 to index
    %c0_7 = arith.constant 0 : index
    %c0_8 = arith.constant 0 : index
    %12 = vector.load %arg5[%11, %c0_7, %c0_8] : memref<8x8x128xf32, #tpu.memory_space<vmem>>, vector<1x8x128xf32>
    %13 = vector.shape_cast %12 : vector<1x8x128xf32> to vector<8x128xf32>
    %14 = vector.shape_cast %10 : vector<8x128xf32> to vector<1x8x128xf32>
    tpu.vector_store %arg5[%11, %c0_7, %c0_8], %14 {strides = array<i32>} : memref<8x8x128xf32, #tpu.memory_space<vmem>>, vector<1x8x128xf32>,
    %c1_i32 = arith.constant 1 : i32
    %15 = arith.index_cast %c1_i32 : i32 to index
    %c0_9 = arith.constant 0 : index
    %c0_10 = arith.constant 0 : index
    %16 = vector.load %arg2[%15, %c0_9, %c0_10] : memref<8x8x128xf32, #tpu.memory_space<vmem>>, vector<1x8x128xf32>
    %17 = vector.shape_cast %16 : vector<1x8x128xf32> to vector<8x128xf32>
    %c0_11 = arith.constant 0 : index
    %c0_12 = arith.constant 0 : index
    %18 = vector.load %arg3[%c0_11, %c0_12] : memref<128x128xf32, #tpu.memory_space<vmem>>, vector<128x128xf32>
    %cst_13 = arith.constant dense<0.000000e+00> : vector<8x128xf32>
    %19 = tpu.matmul %10, %18, %cst_13 {dimension_numbers = #tpu.dot_dimension_numbers<[1], [0], [0], [1], [0, 0, 1, 1], [], []>} : vector<8x128xf32>, vector<128x128xf32>, vector<8x128xf32> -> vector<8x128xf32>
    %20 = arith.addf %17, %19 : vector<8x128xf32>
    %21 = math.tanh %20 : vector<8x128xf32>
    %22 = arith.index_cast %c1_i32 : i32 to index
    %c0_14 = arith.constant 0 : index
    %c0_15 = arith.constant 0 : index
    %23 = vector.load %arg5[%22, %c0_14, %c0_15] : memref<8x8x128xf32, #tpu.memory_space<vmem>>, vector<1x8x128xf32>
    %24 = vector.shape_cast %23 : vector<1x8x128xf32> to vector<8x128xf32>
    %25 = vector.shape_cast %21 : vector<8x128xf32> to vector<1x8x128xf32>
    tpu.vector_store %arg5[%22, %c0_14, %c0_15], %25 {strides = array<i32>} : memref<8x8x128xf32, #tpu.memory_space<vmem>>, vector<1x8x128xf32>,
    %c2_i32 = arith.constant 2 : i32
    %26 = arith.index_cast %c2_i32 : i32 to index
    %c0_16 = arith.constant 0 : index
    %c0_17 = arith.constant 0 : index
    %27 = vector.load %arg2[%26, %c0_16, %c0_17] : memref<8x8x128xf32, #tpu.memory_space<vmem>>, vector<1x8x128xf32>
    %28 = vector.shape_cast %27 : vector<1x8x128xf32> to vector<8x128xf32>
    %c0_18 = arith.constant 0 : index
    %c0_19 = arith.constant 0 : index
    %29 = vector.load %arg3[%c0_18, %c0_19] : memref<128x128xf32, #tpu.memory_space<vmem>>, vector<128x128xf32>
    %cst_20 = arith.constant dense<0.000000e+00> : vector<8x128xf32>
    %30 = tpu.matmul %21, %29, %cst_20 {dimension_numbers = #tpu.dot_dimension_numbers<[1], [0], [0], [1], [0, 0, 1, 1], [], []>} : vector<8x128xf32>, vector<128x128xf32>, vector<8x128xf32> -> vector<8x128xf32>
    %31 = arith.addf %28, %30 : vector<8x128xf32>
    %32 = math.tanh %31 : vector<8x128xf32>
    %33 = arith.index_cast %c2_i32 : i32 to index
    %c0_21 = arith.constant 0 : index
    %c0_22 = arith.constant 0 : index
    %34 = vector.load %arg5[%33, %c0_21, %c0_22] : memref<8x8x128xf32, #tpu.memory_space<vmem>>, vector<1x8x128xf32>
    %35 = vector.shape_cast %34 : vector<1x8x128xf32> to vector<8x128xf32>
    %36 = vector.shape_cast %32 : vector<8x128xf32> to vector<1x8x128xf32>
    tpu.vector_store %arg5[%33, %c0_21, %c0_22], %36 {strides = array<i32>} : memref<8x8x128xf32, #tpu.memory_space<vmem>>, vector<1x8x128xf32>,
    %c3_i32 = arith.constant 3 : i32
    %37 = arith.index_cast %c3_i32 : i32 to index
    %c0_23 = arith.constant 0 : index
    %c0_24 = arith.constant 0 : index
    %38 = vector.load %arg2[%37, %c0_23, %c0_24] : memref<8x8x128xf32, #tpu.memory_space<vmem>>, vector<1x8x128xf32>
    %39 = vector.shape_cast %38 : vector<1x8x128xf32> to vector<8x128xf32>
    %c0_25 = arith.constant 0 : index
    %c0_26 = arith.constant 0 : index
    %40 = vector.load %arg3[%c0_25, %c0_26] : memref<128x128xf32, #tpu.memory_space<vmem>>, vector<128x128xf32>
    %cst_27 = arith.constant dense<0.000000e+00> : vector<8x128xf32>
    %41 = tpu.matmul %32, %40, %cst_27 {dimension_numbers = #tpu.dot_dimension_numbers<[1], [0], [0], [1], [0, 0, 1, 1], [], []>} : vector<8x128xf32>, vector<128x128xf32>, vector<8x128xf32> -> vector<8x128xf32>
    %42 = arith.addf %39, %41 : vector<8x128xf32>
    %43 = math.tanh %42 : vector<8x128xf32>
    %44 = arith.index_cast %c3_i32 : i32 to index
    %c0_28 = arith.constant 0 : index
    %c0_29 = arith.constant 0 : index
    %45 = vector.load %arg5[%44, %c0_28, %c0_29] : memref<8x8x128xf32, #tpu.memory_space<vmem>>, vector<1x8x128xf32>
    %46 = vector.shape_cast %45 : vector<1x8x128xf32> to vector<8x128xf32>
    %47 = vector.shape_cast %43 : vector<8x128xf32> to vector<1x8x128xf32>
    tpu.vector_store %arg5[%44, %c0_28, %c0_29], %47 {strides = array<i32>} : memref<8x8x128xf32, #tpu.memory_space<vmem>>, vector<1x8x128xf32>,
    %c4_i32 = arith.constant 4 : i32
    %48 = arith.index_cast %c4_i32 : i32 to index
    %c0_30 = arith.constant 0 : index
    %c0_31 = arith.constant 0 : index
    %49 = vector.load %arg2[%48, %c0_30, %c0_31] : memref<8x8x128xf32, #tpu.memory_space<vmem>>, vector<1x8x128xf32>
    %50 = vector.shape_cast %49 : vector<1x8x128xf32> to vector<8x128xf32>
    %c0_32 = arith.constant 0 : index
    %c0_33 = arith.constant 0 : index
    %51 = vector.load %arg3[%c0_32, %c0_33] : memref<128x128xf32, #tpu.memory_space<vmem>>, vector<128x128xf32>
    %cst_34 = arith.constant dense<0.000000e+00> : vector<8x128xf32>
    %52 = tpu.matmul %43, %51, %cst_34 {dimension_numbers = #tpu.dot_dimension_numbers<[1], [0], [0], [1], [0, 0, 1, 1], [], []>} : vector<8x128xf32>, vector<128x128xf32>, vector<8x128xf32> -> vector<8x128xf32>
    %53 = arith.addf %50, %52 : vector<8x128xf32>
    %54 = math.tanh %53 : vector<8x128xf32>
    %55 = arith.index_cast %c4_i32 : i32 to index
    %c0_35 = arith.constant 0 : index
    %c0_36 = arith.constant 0 : index
    %56 = vector.load %arg5[%55, %c0_35, %c0_36] : memref<8x8x128xf32, #tpu.memory_space<vmem>>, vector<1x8x128xf32>
    %57 = vector.shape_cast %56 : vector<1x8x128xf32> to vector<8x128xf32>
    %58 = vector.shape_cast %54 : vector<8x128xf32> to vector<1x8x128xf32>
    tpu.vector_store %arg5[%55, %c0_35, %c0_36], %58 {strides = array<i32>} : memref<8x8x128xf32, #tpu.memory_space<vmem>>, vector<1x8x128xf32>,
    %c5_i32 = arith.constant 5 : i32
    %59 = arith.index_cast %c5_i32 : i32 to index
    %c0_37 = arith.constant 0 : index
    %c0_38 = arith.constant 0 : index
    %60 = vector.load %arg2[%59, %c0_37, %c0_38] : memref<8x8x128xf32, #tpu.memory_space<vmem>>, vector<1x8x128xf32>
    %61 = vector.shape_cast %60 : vector<1x8x128xf32> to vector<8x128xf32>
    %c0_39 = arith.constant 0 : index
    %c0_40 = arith.constant 0 : index
    %62 = vector.load %arg3[%c0_39, %c0_40] : memref<128x128xf32, #tpu.memory_space<vmem>>, vector<128x128xf32>
    %cst_41 = arith.constant dense<0.000000e+00> : vector<8x128xf32>
    %63 = tpu.matmul %54, %62, %cst_41 {dimension_numbers = #tpu.dot_dimension_numbers<[1], [0], [0], [1], [0, 0, 1, 1], [], []>} : vector<8x128xf32>, vector<128x128xf32>, vector<8x128xf32> -> vector<8x128xf32>
    %64 = arith.addf %61, %63 : vector<8x128xf32>
    %65 = math.tanh %64 : vector<8x128xf32>
    %66 = arith.index_cast %c5_i32 : i32 to index
    %c0_42 = arith.constant 0 : index
    %c0_43 = arith.constant 0 : index
    %67 = vector.load %arg5[%66, %c0_42, %c0_43] : memref<8x8x128xf32, #tpu.memory_space<vmem>>, vector<1x8x128xf32>
    %68 = vector.shape_cast %67 : vector<1x8x128xf32> to vector<8x128xf32>
    %69 = vector.shape_cast %65 : vector<8x128xf32> to vector<1x8x128xf32>
    tpu.vector_store %arg5[%66, %c0_42, %c0_43], %69 {strides = array<i32>} : memref<8x8x128xf32, #tpu.memory_space<vmem>>, vector<1x8x128xf32>,
    %c6_i32 = arith.constant 6 : i32
    %70 = arith.index_cast %c6_i32 : i32 to index
    %c0_44 = arith.constant 0 : index
    %c0_45 = arith.constant 0 : index
    %71 = vector.load %arg2[%70, %c0_44, %c0_45] : memref<8x8x128xf32, #tpu.memory_space<vmem>>, vector<1x8x128xf32>
    %72 = vector.shape_cast %71 : vector<1x8x128xf32> to vector<8x128xf32>
    %c0_46 = arith.constant 0 : index
    %c0_47 = arith.constant 0 : index
    %73 = vector.load %arg3[%c0_46, %c0_47] : memref<128x128xf32, #tpu.memory_space<vmem>>, vector<128x128xf32>
    %cst_48 = arith.constant dense<0.000000e+00> : vector<8x128xf32>
    %74 = tpu.matmul %65, %73, %cst_48 {dimension_numbers = #tpu.dot_dimension_numbers<[1], [0], [0], [1], [0, 0, 1, 1], [], []>} : vector<8x128xf32>, vector<128x128xf32>, vector<8x128xf32> -> vector<8x128xf32>
    %75 = arith.addf %72, %74 : vector<8x128xf32>
    %76 = math.tanh %75 : vector<8x128xf32>
    %77 = arith.index_cast %c6_i32 : i32 to index
    %c0_49 = arith.constant 0 : index
    %c0_50 = arith.constant 0 : index
    %78 = vector.load %arg5[%77, %c0_49, %c0_50] : memref<8x8x128xf32, #tpu.memory_space<vmem>>, vector<1x8x128xf32>
    %79 = vector.shape_cast %78 : vector<1x8x128xf32> to vector<8x128xf32>
    %80 = vector.shape_cast %76 : vector<8x128xf32> to vector<1x8x128xf32>
    tpu.vector_store %arg5[%77, %c0_49, %c0_50], %80 {strides = array<i32>} : memref<8x8x128xf32, #tpu.memory_space<vmem>>, vector<1x8x128xf32>,
    %c7_i32 = arith.constant 7 : i32
    %81 = arith.index_cast %c7_i32 : i32 to index
    %c0_51 = arith.constant 0 : index
    %c0_52 = arith.constant 0 : index
    %82 = vector.load %arg2[%81, %c0_51, %c0_52] : memref<8x8x128xf32, #tpu.memory_space<vmem>>, vector<1x8x128xf32>
    %83 = vector.shape_cast %82 : vector<1x8x128xf32> to vector<8x128xf32>
    %c0_53 = arith.constant 0 : index
    %c0_54 = arith.constant 0 : index
    %84 = vector.load %arg3[%c0_53, %c0_54] : memref<128x128xf32, #tpu.memory_space<vmem>>, vector<128x128xf32>
    %cst_55 = arith.constant dense<0.000000e+00> : vector<8x128xf32>
    %85 = tpu.matmul %76, %84, %cst_55 {dimension_numbers = #tpu.dot_dimension_numbers<[1], [0], [0], [1], [0, 0, 1, 1], [], []>} : vector<8x128xf32>, vector<128x128xf32>, vector<8x128xf32> -> vector<8x128xf32>
    %86 = arith.addf %83, %85 : vector<8x128xf32>
    %87 = math.tanh %86 : vector<8x128xf32>
    %88 = arith.index_cast %c7_i32 : i32 to index
    %c0_56 = arith.constant 0 : index
    %c0_57 = arith.constant 0 : index
    %89 = vector.load %arg5[%88, %c0_56, %c0_57] : memref<8x8x128xf32, #tpu.memory_space<vmem>>, vector<1x8x128xf32>
    %90 = vector.shape_cast %89 : vector<1x8x128xf32> to vector<8x128xf32>
    %91 = vector.shape_cast %87 : vector<8x128xf32> to vector<1x8x128xf32>
    tpu.vector_store %arg5[%88, %c0_56, %c0_57], %91 {strides = array<i32>} : memref<8x8x128xf32, #tpu.memory_space<vmem>>, vector<1x8x128xf32>,
    %c8_i32 = arith.constant 8 : i32
    %c0_58 = arith.constant 0 : index
    %c0_59 = arith.constant 0 : index
    %92 = vector.load %arg6[%c0_58, %c0_59] : memref<8x128xf32, #tpu.memory_space<vmem>>, vector<8x128xf32>
    tpu.vector_store %arg6[%c0_58, %c0_59], %87 {strides = array<i32>} : memref<8x128xf32, #tpu.memory_space<vmem>>, vector<8x128xf32>,
    return
  }
  func.func @transform_0(%arg0: i32, %arg1: i32) -> (i32, i32, i32) {
    %c0_i32 = arith.constant 0 : i32
    %c0_i32_0 = arith.constant 0 : i32
    return %arg1, %arg0, %c0_i32 : i32, i32, i32
  }
  func.func @transform_1(%arg0: i32, %arg1: i32) -> (i32, i32) {
    %c0_i32 = arith.constant 0 : i32
    %c0_i32_0 = arith.constant 0 : i32
    %c0_i32_1 = arith.constant 0 : i32
    return %c0_i32, %c0_i32_0 : i32, i32
  }
  func.func @transform_2(%arg0: i32, %arg1: i32) -> (i32, i32) {
    %c0_i32 = arith.constant 0 : i32
    %c0_i32_0 = arith.constant 0 : i32
    return %arg0, %c0_i32 : i32, i32
  }
  func.func @transform_3(%arg0: i32, %arg1: i32) -> (i32, i32, i32) {
    %c0_i32 = arith.constant 0 : i32
    %c0_i32_0 = arith.constant 0 : i32
    return %arg1, %arg0, %c0_i32 : i32, i32, i32
  }
  func.func @transform_4(%arg0: i32, %arg1: i32) -> (i32, i32) {
    %c0_i32 = arith.constant 0 : i32
    %c0_i32_0 = arith.constant 0 : i32
    return %arg0, %c0_i32 : i32, i32
  }
}

</mosaic_0001>

<bundles_post_ra>
// kernel: tpu_custom_call.1
= control target key start
LH: loop header
LB: loop body
LE: loop exit
PB: predicated region body
PF: predicated region fallthrough
CT: control target
= control target key end

     0   :  { %s1508_s0 = inlined_call_operand.hbm [shape: f32[32,8,128], index: 0, kind: input, shape index: {}]   ;;  %s1509_s1 = inlined_call_operand.hbm [shape: f32[128,128], index: 1, kind: input, shape index: {}]   ;;  %s1510_s2 = inlined_call_operand.hbm [shape: f32[8,128], index: 2, kind: input, shape index: {}]   ;;  %s1511_s3 = inlined_call_operand.hbm [shape: f32[32,8,128], index: 3, kind: output, shape index: {0}]   ;;  %s1512_s4 = inlined_call_operand.hbm [shape: f32[8,128], index: 4, kind: output, shape index: {1}]  }
   0x1   :  { %1515 = sst [smem:[#allocation15_spill]] %s1509_s1 }
   0x2   :  { %1516 = sst [smem:[#allocation16_spill]] %s1510_s2 }
   0x3   :  { %10 = vsyncpa [#allocation3], 0 }
   0x4   :  { %12 = vsyncpa [#allocation3 + $0x1], 0 }
   0x5   :  { %13 = vsyncpa [#allocation6], 0 }
   0x6   :  { %14 = vsyncpa [#allocation4], 0 }
   0x7   :  { %16 = vsyncpa [#allocation4 + $0x1], 0 }
   0x8   :  { %17 = vsyncpa [#allocation10], 0  ;;  %s1162_s15 = smov 0   ;;  %s1164_s16 = smov 0  }
   0x9   :  { %s1166_s17 = smov 0   ;;  %s1168_s18 = smov 0  }
   0xa   :  { %s1170_s19 = smov 0   ;;  %s1172_s20 = smov 0  }
   0xb LB: > { %s772_s21 = sadd.s32 4294967295, %s1128_s20   ;;  %s773_s22 = sadd.s32 4294967294, %s1128_s20   ;;  %s1128_s20 = sphi %s1172_s20, %s23_s20   ;;  %s1124_s19 = sphi %s1170_s19, %s1531_s19   ;;  %s1120_s18 = sphi %s1168_s18, %s1530_s18   ;;  %s1116_s17 = sphi %s1166_s17, %s1529_s17   ;;  %s1112_s16 = sphi %s1164_s16, %s1528_s16   ;;  %s1108_s15 = sphi %s1162_s15, %s1527_s15  }
   0xc   : > { %p57_p0 = scmp.ne.s32.totalorder %s1112_s16, %s1108_s15  ;;  %p1196_p1 = scmp.eq.s32.totalorder %s772_s21, 0 }
   0xd   : > { %p136_p2 = scmp.eq.s32.totalorder %s773_s22, 3  ;;  %p774_p4 = scmp.ge.s32.totalorder %s1128_s20, 1 }
   0xe   : > { %p1202_p3 = por %p1196_p1, %p57_p0  ;;  %p169_p6 = scmp.lt.s32.totalorder %s1128_s20, 5 }
   0xf   : > { %p1207_p5 = por %p136_p2, %p57_p0  ;;  %s1520_s1 = sld [smem:[#allocation15_spill]] }
  0x10   : > { %p1215_p7 = pnand %p774_p4, %p169_p6  ;;  %s1130_s30 = smov [#allocation5]  }
  0x11   : > { %s182_s5 = sshll.u32 %s1130_s30, 4  ;;  %s1522_s2 = sld [smem:[#allocation16_spill]]  ;;  %s183_s5 = int_to_ptr.vmem [resolvable:$true] %s182_s5 }
  0x12   : > { %p826_p8 = pneg %p1215_p7  ;;  %s1513_s9 = smov 128  }
  0x13   : > { %s1514_s10 = smov 8   ;;  %s1133_s11 = smov [#allocation7]  }
  0x14   : > { %p827_p9 = pnand %p826_p8, %p1196_p1  ;;  %s199_s12 = sshll.u32 %s1133_s11, 4  ;;  %s200_s12 = int_to_ptr.vmem [resolvable:$true] %s199_s12 }
  0x15   : > { %s180_s28 = sshll.u32 %s1520_s1, 4  ;;  %p1229_p10 = scmp.eq.s32.totalorder %s772_s21, 3  ;;  %s181_s28 = int_to_ptr.hbm [resolvable:$true] %s180_s28 }
  0x16   : > { %829 = dma.hbm_to_vmem [thread:$0]  (!%p827_p9), %s181_s28, 2048, %s183_s5, [#allocation6], %s1513_s9, %s1513_s9, %s1514_s10  }
  0x17   : > { %s197_s8 = sshll.u32 %s1522_s2, 4  ;;  %s32_s14 = sadd.s32 1, %s1124_s19  ;;  %s198_s8 = int_to_ptr.hbm [resolvable:$true] %s197_s8 }
  0x18   : > { %832 = dma.hbm_to_vmem [thread:$0]  (!%p827_p9), %s198_s8, 128, %s200_s12, [#allocation6]  }
  0x19   : > { %p33_p11 = scmp.ge.s32.totalorder %s32_s14, 4  ;;  %s44_s22 = sadd.s32 1, %s1116_s17 }
  0x1a   : > { %p51_p12 = scmp.ne.s32.totalorder %s1116_s17, %s1112_s16  ;;  %p52_p13 = scmp.eq.s32.totalorder %s1128_s20, 0 }
  0x1b   : > { %s1533_s14 = smov (%p33_p11, %s32_s14), 0  ;;  %p843_p2 = scmp.lt.s32.totalorder %s1128_s20, 4 }
  0x1c   : > { %p1242_p0 = por %p1229_p10, %p51_p12  ;;  %s39_s21 = ssub.s32 %s1124_s19, %s1533_s14 }
  0x1d   : > { %s210_s27 = sand.u32 1, %s1116_s17   ;;  %p42_p4 = scmp.eq.s32.totalorder %s39_s21, 0 }
  0x1e   : > { %p53_p6 = por %p52_p13, %p51_p12  ;;  %s778_s28 = sshll.u32 %s210_s27, 6 }
  0x1f   : > { %s808_s30 = sshll.u32 %s1124_s19, 6  ;;  %s214_s12 = scalar_lea.vmem [#allocation2], %s778_s28 }
  0x20   : > { %s1252_s5 = scalar_select %p42_p4, %s1116_s17, %s44_s22  }
  0x21   : > { %s220_s8 = scalar_lea.hbm %s1508_s0, %s808_s30  ;;  %s223_s9 = sshll.u32 %s214_s12, 4  ;;  %s224_s9 = int_to_ptr.vmem [resolvable:$true] %s223_s9 }
  0x22   : > { %s221_s11 = sshll.u32 %s220_s8, 4  ;;  %p834_p8 = pnand %p843_p2, %p53_p6  ;;  %s222_s11 = int_to_ptr.hbm [resolvable:$true] %s221_s11 }
  0x23   : > { %s211_s10 = scalar_lea.sflag [#allocation3], %s210_s27  ;;  %s1525_s1 = smov 8  }
  0x24   : > { %s1526_s2 = smov 128   ;;  %235 = sbr.rel (%p1215_p7) target bundleno = 1197 (0x4ad), region = 32 }
  0x25   : > { %836 = dma.hbm_to_vmem [thread:$0]  (!%p834_p8), %s222_s11, 1024, %s224_s9, %s211_s10, %s1526_s2, %s1526_s2, %s1525_s1  }
  0x26   : > { %s1265_s22 = sand.u32 (!%p1215_p7), 1, %s1112_s16  }
  0x27   : > { %s782_s21 = sshll.u32 (!%p1215_p7), %s1265_s22, 6  ;;  %s238_s28 = scalar_lea.sflag (!%p1215_p7), [#allocation3], %s1265_s22 }
  0x28   : > { %s1269_s30 = scalar_lea.vmem (!%p1215_p7), [#allocation2], %s782_s21 }
  0x29   : > { %1091 = dma.done.wait (%p1202_p3), %s238_s28, 1024  }
  0x2a   : > { %1093 = vsyncadd (%p1202_p3), %s238_s28, 4294966272 }
  0x2b   : > { %1095 = dma.done.wait (%p1196_p1), [#allocation6], 2176  }
  0x2c   : > { %1097 = vsyncadd (%p1196_p1), [#allocation6], 4294965120  ;;  %s1279_s1 = scalar_lea.vmem [#allocation8], %s782_s21  ;;  %p786_p7 = scmp.ne.s32.totalorder %s1120_s18, 0 }
  0x2e   : > { %282 = sbr.rel (%p786_p7) target bundleno = 53 (0x35), region = 48 }
  0x33   : > { %v283_v0 = vld [vmem:[#allocation7] sm:$0xff] }
  0x34   : > { %284 = vst [vmem:[#allocation9] sm:$0xff] %v283_v0 }
  0x35 PF: > { %v1282_v1 = vld [vmem:[#allocation5 + $0x78] sm:$0xff]  ;;  %v1284_v2 = vld [vmem:[#allocation5 + $0x70] sm:$0xff]  ;;  %v1288_v3 = vld [vmem:[#allocation5 + $0x68] sm:$0xff]  ;;  %s809_s2 = sshll.u32 %s1120_s18, 6  ;;  %s635_s9 = sshll.u32 %s1279_s1, 4  ;;  %s636_s9 = int_to_ptr.vmem [resolvable:$true] %s635_s9 }
  0x36   : > { %303 = vmatpush.msra.mxu0 %v1282_v1  ;;  %344 = vmatpush.msra.mxu1 %v1282_v1  ;;  %v1294_v4 = vld [vmem:[#allocation5 + $0x60] sm:$0xff]  ;;  %v1300_v5 = vld [vmem:[#allocation5 + $0x58] sm:$0xff]  ;;  %v1306_v6 = vld [vmem:[#allocation5 + $0x50] sm:$0xff]  ;;  %s634_s29 = scalar_lea.hbm %s1511_s3, %s809_s2  ;;  %s1134_s27 = smov [#allocation9]  }
  0x37   : > { %386 = vmatpush.msra.mxu2 %v1282_v1  ;;  %428 = vmatpush.msra.mxu3 %v1282_v1  ;;  %v1312_v7 = vld [vmem:[#allocation5 + $0x48] sm:$0xff]  ;;  %v1318_v8 = vld [vmem:[#allocation5 + $0x40] sm:$0xff]  ;;  %v1324_v9 = vld [vmem:[#allocation5 + $0x38] sm:$0xff]  ;;  %s637_s10 = sshll.u32 %s634_s29, 4  ;;  %s1462_s6 = sshll.u32 %s1134_s27, 4  ;;  %s638_s10 = int_to_ptr.hbm [resolvable:$true] %s637_s10  ;;  %s653_s6 = int_to_ptr.vmem [resolvable:$true] %s1462_s6 }
  0x38   : > { %304 = vmatpush.msra.mxu0 %v1284_v2  ;;  %345 = vmatpush.msra.mxu1 %v1284_v2  ;;  %v1330_v10 = vld [vmem:[#allocation5 + $0x30] sm:$0xff]  ;;  %v1336_v11 = vld [vmem:[#allocation5 + $0x28] sm:$0xff]  ;;  %v1342_v12 = vld [vmem:[#allocation5 + $0x20] sm:$0xff]  ;;  %s654_s11 = sshll.u32 %s1512_s4, 4  ;;  %s622_s18 = scalar_lea.sflag [#allocation4], %s1265_s22  ;;  %s655_s11 = int_to_ptr.hbm [resolvable:$true] %s654_s11 }
  0x39   : > { %387 = vmatpush.msra.mxu2 %v1284_v2  ;;  %429 = vmatpush.msra.mxu3 %v1284_v2  ;;  %v1348_v13 = vld [vmem:[#allocation5 + $0x18] sm:$0xff]  ;;  %v1354_v14 = vld [vmem:[#allocation5 + $0x10] sm:$0xff]  ;;  %v1360_v15 = vld [vmem:[#allocation5 + $0x8] sm:$0xff]  ;;  %s1024_s12 = sshra.s32 %s638_s10, 4  ;;  %s1030_s2 = scalar_lea.hbm %s1511_s3, 256  ;;  %s1025_s12 = int_to_ptr.hbm [resolvable:$true] %s1024_s12 }
  0x3a   : > { %305 = vmatpush.msra.mxu0 %v1288_v3  ;;  %346 = vmatpush.msra.mxu1 %v1288_v3  ;;  %v1366_v16 = vld [vmem:[#allocation5] sm:$0xff]  ;;  %v787_v22 = vld [vmem:[%s1269_s30 + $0x8] sm:$0xff]  ;;  %v789_v26 = vld [vmem:[%s1269_s30 + $0x10] sm:$0xff]  ;;  %s1026_s21 = scalar_lea.hbm %s1025_s12, 64  ;;  %p1031_p11 = scmp.lt.s32.totalorder %s1025_s12, %s1511_s3 }
  0x3b   : > { %388 = vmatpush.msra.mxu2 %v1288_v3  ;;  %430 = vmatpush.msra.mxu3 %v1288_v3  ;;  %v285_v17 = vld [vmem:[#allocation9] sm:$0xff]  ;;  %v286_v18 = vld [vmem:[%s1269_s30] sm:$0xff]  ;;  %v791_v30 = vld [vmem:[%s1269_s30 + $0x18] sm:$0xff]  ;;  %p1027_p1 = scmp.ne.s32.totalorder %s1025_s12, %s1026_s21  ;;  %p1032_p12 = scmp.lt.s32.totalorder %s1030_s2, %s1026_s21 }
  0x3c   : > { %306 = vmatpush.msra.mxu0 %v1294_v4  ;;  %347 = vmatpush.msra.mxu1 %v1294_v4  ;;  %v793_v34 = vld [vmem:[%s1269_s30 + $0x20] sm:$0xff]  ;;  %v795_v38 = vld [vmem:[%s1269_s30 + $0x28] sm:$0xff]  ;;  %v797_v42 = vld [vmem:[%s1269_s30 + $0x30] sm:$0xff] }
  0x3d   : > { %389 = vmatpush.msra.mxu2 %v1294_v4  ;;  %431 = vmatpush.msra.mxu3 %v1294_v4  ;;  %v799_v46 = vld [vmem:[%s1269_s30 + $0x38] sm:$0xff]  ;;  %p1028_p3 = pnand %p1027_p1, %p1242_p0  ;;  %p1033_p13 = por %p1032_p12, %p1031_p11 }
  0x3e   : > { %307 = vmatpush.msra.mxu0 %v1300_v5  ;;  %348 = vmatpush.msra.mxu1 %v1300_v5 }
  0x3f   : > { %390 = vmatpush.msra.mxu2 %v1300_v5  ;;  %432 = vmatpush.msra.mxu3 %v1300_v5  ;;  %p1029_p9 = pneg %p1028_p3 }
  0x40   : > { %308 = vmatpush.msra.mxu0 %v1306_v6  ;;  %349 = vmatpush.msra.mxu1 %v1306_v6 }
  0x41   : > { %391 = vmatpush.msra.mxu2 %v1306_v6  ;;  %433 = vmatpush.msra.mxu3 %v1306_v6  ;;  %p1034_p2 = pnand %p1033_p13, %p1029_p9 }
  0x42   : > { %309 = vmatpush.msra.mxu0 %v1312_v7  ;;  %350 = vmatpush.msra.mxu1 %v1312_v7 }
  0x43   : > { %392 = vmatpush.msra.mxu2 %v1312_v7  ;;  %434 = vmatpush.msra.mxu3 %v1312_v7 }
  0x44   : > { %310 = vmatpush.msra.mxu0 %v1318_v8  ;;  %351 = vmatpush.msra.mxu1 %v1318_v8 }
  0x45   : > { %393 = vmatpush.msra.mxu2 %v1318_v8  ;;  %435 = vmatpush.msra.mxu3 %v1318_v8 }
  0x46   : > { %311 = vmatpush.msra.mxu0 %v1324_v9  ;;  %352 = vmatpush.msra.mxu1 %v1324_v9 }
  0x47   : > { %394 = vmatpush.msra.mxu2 %v1324_v9  ;;  %436 = vmatpush.msra.mxu3 %v1324_v9 }
  0x48   : > { %312 = vmatpush.msra.mxu0 %v1330_v10  ;;  %353 = vmatpush.msra.mxu1 %v1330_v10 }
  0x49   : > { %395 = vmatpush.msra.mxu2 %v1330_v10  ;;  %437 = vmatpush.msra.mxu3 %v1330_v10 }
  0x4a   : > { %313 = vmatpush.msra.mxu0 %v1336_v11  ;;  %354 = vmatpush.msra.mxu1 %v1336_v11 }
  0x4b   : > { %396 = vmatpush.msra.mxu2 %v1336_v11  ;;  %438 = vmatpush.msra.mxu3 %v1336_v11 }
  0x4c   : > { %314 = vmatpush.msra.mxu0 %v1342_v12  ;;  %355 = vmatpush.msra.mxu1 %v1342_v12 }
  0x4d   : > { %397 = vmatpush.msra.mxu2 %v1342_v12  ;;  %439 = vmatpush.msra.mxu3 %v1342_v12 }
  0x4e   : > { %315 = vmatpush.msra.mxu0 %v1348_v13  ;;  %356 = vmatpush.msra.mxu1 %v1348_v13 }
  0x4f   : > { %398 = vmatpush.msra.mxu2 %v1348_v13  ;;  %440 = vmatpush.msra.mxu3 %v1348_v13 }
  0x50   : > { %316 = vmatpush.msra.mxu0 %v1354_v14  ;;  %357 = vmatpush.msra.mxu1 %v1354_v14 }
  0x51   : > { %399 = vmatpush.msra.mxu2 %v1354_v14  ;;  %441 = vmatpush.msra.mxu3 %v1354_v14 }
  0x52   : > { %317 = vmatpush.msra.mxu0 %v1360_v15  ;;  %358 = vmatpush.msra.mxu1 %v1360_v15 }
  0x53   : > { %400 = vmatpush.msra.mxu2 %v1360_v15  ;;  %442 = vmatpush.msra.mxu3 %v1360_v15 }
  0x54   : > { %318 = vmatpush.msra.mxu0 %v1366_v16  ;;  %359 = vmatpush.msra.mxu1 %v1366_v16 }
  0x55   : > { %319 = vmatmul.f32.vlgmr.msra.gmra.mxu0 %v285_v17  ;;  %401 = vmatpush.msra.mxu2 %v1366_v16 }
  0x56   : > { %443 = vmatpush.msra.mxu3 %v1366_v16  ;;  %470 = vmatpush.msrb.mxu0 %v1282_v1 }
  0x57   : > { %512 = vmatpush.msrb.mxu1 %v1282_v1  ;;  %554 = vmatpush.msrb.mxu2 %v1282_v1 }
  0x58   : > { %471 = vmatpush.msrb.mxu0 %v1284_v2  ;;  %596 = vmatpush.msrb.mxu3 %v1282_v1 }
  0x59   : > { %513 = vmatpush.msrb.mxu1 %v1284_v2  ;;  %555 = vmatpush.msrb.mxu2 %v1284_v2 }
  0x5a   : > { %472 = vmatpush.msrb.mxu0 %v1288_v3  ;;  %597 = vmatpush.msrb.mxu3 %v1284_v2 }
  0x5b   : > { %514 = vmatpush.msrb.mxu1 %v1288_v3  ;;  %556 = vmatpush.msrb.mxu2 %v1288_v3 }
  0x5c   : > { %473 = vmatpush.msrb.mxu0 %v1294_v4  ;;  %598 = vmatpush.msrb.mxu3 %v1288_v3 }
  0x5d   : > { %515 = vmatpush.msrb.mxu1 %v1294_v4  ;;  %557 = vmatpush.msrb.mxu2 %v1294_v4 }
  0x5e   : > { %474 = vmatpush.msrb.mxu0 %v1300_v5  ;;  %599 = vmatpush.msrb.mxu3 %v1294_v4 }
  0x5f   : > { %516 = vmatpush.msrb.mxu1 %v1300_v5  ;;  %558 = vmatpush.msrb.mxu2 %v1300_v5 }
  0x60   : > { %475 = vmatpush.msrb.mxu0 %v1306_v6  ;;  %600 = vmatpush.msrb.mxu3 %v1300_v5 }
  0x61   : > { %517 = vmatpush.msrb.mxu1 %v1306_v6  ;;  %559 = vmatpush.msrb.mxu2 %v1306_v6 }
  0x62   : > { %476 = vmatpush.msrb.mxu0 %v1312_v7  ;;  %601 = vmatpush.msrb.mxu3 %v1306_v6 }
  0x63   : > { %518 = vmatpush.msrb.mxu1 %v1312_v7  ;;  %560 = vmatpush.msrb.mxu2 %v1312_v7 }
  0x64   : > { %477 = vmatpush.msrb.mxu0 %v1318_v8  ;;  %602 = vmatpush.msrb.mxu3 %v1312_v7 }
  0x65   : > { %519 = vmatpush.msrb.mxu1 %v1318_v8  ;;  %561 = vmatpush.msrb.mxu2 %v1318_v8 }
  0x66   : > { %478 = vmatpush.msrb.mxu0 %v1324_v9  ;;  %603 = vmatpush.msrb.mxu3 %v1318_v8 }
  0x67   : > { %520 = vmatpush.msrb.mxu1 %v1324_v9  ;;  %562 = vmatpush.msrb.mxu2 %v1324_v9 }
  0x68   : > { %479 = vmatpush.msrb.mxu0 %v1330_v10  ;;  %604 = vmatpush.msrb.mxu3 %v1324_v9 }
  0x69   : > { %521 = vmatpush.msrb.mxu1 %v1330_v10  ;;  %563 = vmatpush.msrb.mxu2 %v1330_v10 }
  0x6a   : > { %480 = vmatpush.msrb.mxu0 %v1336_v11  ;;  %605 = vmatpush.msrb.mxu3 %v1330_v10 }
  0x6b   : > { %522 = vmatpush.msrb.mxu1 %v1336_v11  ;;  %564 = vmatpush.msrb.mxu2 %v1336_v11 }
  0x6c   : > { %481 = vmatpush.msrb.mxu0 %v1342_v12  ;;  %606 = vmatpush.msrb.mxu3 %v1336_v11 }
  0x6d   : > { %523 = vmatpush.msrb.mxu1 %v1342_v12  ;;  %565 = vmatpush.msrb.mxu2 %v1342_v12 }
  0x6e   : > { %482 = vmatpush.msrb.mxu0 %v1348_v13  ;;  %607 = vmatpush.msrb.mxu3 %v1342_v12 }
  0x6f   : > { %524 = vmatpush.msrb.mxu1 %v1348_v13  ;;  %566 = vmatpush.msrb.mxu2 %v1348_v13 }
  0x70   : > { %483 = vmatpush.msrb.mxu0 %v1354_v14  ;;  %608 = vmatpush.msrb.mxu3 %v1348_v13 }
  0x71   : > { %525 = vmatpush.msrb.mxu1 %v1354_v14  ;;  %567 = vmatpush.msrb.mxu2 %v1354_v14 }
  0x72   : > { %484 = vmatpush.msrb.mxu0 %v1360_v15  ;;  %609 = vmatpush.msrb.mxu3 %v1354_v14 }
  0x73   : > { %526 = vmatpush.msrb.mxu1 %v1360_v15  ;;  %568 = vmatpush.msrb.mxu2 %v1360_v15 }
  0x74   : > { %485 = vmatpush.msrb.mxu0 %v1366_v16  ;;  %610 = vmatpush.msrb.mxu3 %v1360_v15 }
  0x75   : > { %527 = vmatpush.msrb.mxu1 %v1366_v16  ;;  %569 = vmatpush.msrb.mxu2 %v1366_v16 }
  0x76   : > { %611 = vmatpush.msrb.mxu3 %v1366_v16 }
  0xd2   : > { %v320_v19 = vpop.f32.mrf.mxu0 }
  0xd3   : > { %v323_v20 = vadd.f32 %v320_v19, %v286_v18 }
  0xd5   : > { %904 = vtanh.f32 %v323_v20 }
  0xdb   : > { %v905_v21 = vpop.eup %904 }
  0xdc   : > { %325 = vst [vmem:[%s1279_s1] sm:$0xff] %v905_v21  ;;  %360 = vmatmul.f32.vlgmr.msra.gmra.mxu1 %v905_v21 }
 0x159   : > { %v361_v23 = vpop.f32.mrf.mxu1 }
 0x15a   : > { %v364_v24 = vadd.f32 %v787_v22, %v361_v23 }
 0x15c   : > { %906 = vtanh.f32 %v364_v24 }
 0x162   : > { %v907_v25 = vpop.eup %906 }
 0x163   : > { %788 = vst [vmem:[%s1279_s1 + $0x8] sm:$0xff] %v907_v25  ;;  %402 = vmatmul.f32.vlgmr.msra.gmra.mxu2 %v907_v25 }
 0x1e6   : > { %v403_v27 = vpop.f32.mrf.mxu2 }
 0x1e7   : > { %v406_v28 = vadd.f32 %v789_v26, %v403_v27 }
 0x1e9   : > { %908 = vtanh.f32 %v406_v28 }
 0x1ef   : > { %v909_v29 = vpop.eup %908 }
 0x1f0   : > { %790 = vst [vmem:[%s1279_s1 + $0x10] sm:$0xff] %v909_v29  ;;  %444 = vmatmul.f32.vlgmr.msra.gmra.mxu3 %v909_v29 }
 0x273   : > { %v445_v31 = vpop.f32.mrf.mxu3 }
 0x274   : > { %v448_v32 = vadd.f32 %v791_v30, %v445_v31 }
 0x276   : > { %910 = vtanh.f32 %v448_v32 }
 0x27c   : > { %v911_v33 = vpop.eup %910 }
 0x27d   : > { %792 = vst [vmem:[%s1279_s1 + $0x18] sm:$0xff] %v911_v33  ;;  %486 = vmatmul.f32.vlgmr.msrb.gmra.mxu0 %v911_v33 }
 0x2fa   : > { %v487_v35 = vpop.f32.mrf.mxu0 }
 0x2fb   : > { %v490_v36 = vadd.f32 %v793_v34, %v487_v35 }
 0x2fd   : > { %912 = vtanh.f32 %v490_v36 }
 0x303   : > { %v913_v37 = vpop.eup %912 }
 0x304   : > { %794 = vst [vmem:[%s1279_s1 + $0x20] sm:$0xff] %v913_v37  ;;  %528 = vmatmul.f32.vlgmr.msrb.gmra.mxu1 %v913_v37 }
 0x381   : > { %v529_v39 = vpop.f32.mrf.mxu1 }
 0x382   : > { %v532_v40 = vadd.f32 %v795_v38, %v529_v39 }
 0x384   : > { %914 = vtanh.f32 %v532_v40 }
 0x38a   : > { %v915_v41 = vpop.eup %914 }
 0x38b   : > { %796 = vst [vmem:[%s1279_s1 + $0x28] sm:$0xff] %v915_v41  ;;  %570 = vmatmul.f32.vlgmr.msrb.gmra.mxu2 %v915_v41 }
 0x40e   : > { %v571_v43 = vpop.f32.mrf.mxu2 }
 0x40f   : > { %v574_v44 = vadd.f32 %v797_v42, %v571_v43 }
 0x411   : > { %916 = vtanh.f32 %v574_v44 }
 0x417   : > { %v917_v45 = vpop.eup %916 }
 0x418   : > { %798 = vst [vmem:[%s1279_s1 + $0x30] sm:$0xff] %v917_v45  ;;  %612 = vmatmul.f32.vlgmr.msrb.gmra.mxu3 %v917_v45 }
 0x49b   : > { %v613_v47 = vpop.f32.mrf.mxu3 }
 0x49c   : > { %v616_v48 = vadd.f32 %v799_v46, %v613_v47 }
 0x49e   : > { %918 = vtanh.f32 %v616_v48 }
 0x4a4   : > { %v919_v49 = vpop.eup %918 }
 0x4a5   : > { %800 = vst [vmem:[%s1279_s1 + $0x38] sm:$0xff] %v919_v49 }
 0x4a6   : > { %620 = vst [vmem:[#allocation9] sm:$0xff] %v919_v49 }
 0x4a7   : > { %1037 = shalt.err (!%p1034_p2)
}
 0x4a8   : > { %s1135_s22 = smov 128   ;;  %s1136_s1 = smov 8  }
 0x4a9   : > { %820 = dma.vmem_to_hbm [thread:$0]  (%p1242_p0), %s636_s9, 1024, %s638_s10, %s622_s18, %s1135_s22, %s1135_s22, %s1136_s1  }
 0x4aa   : > { %822 = dma.vmem_to_hbm [thread:$0]  (%p1229_p10), %s653_s6, 128, %s655_s11, [#allocation10]  }
 0x4ab   : > { %1099 = dma.done.wait (%p1229_p10), [#allocation10], 128  }
 0x4ac   : > { %1101 = vsyncadd (%p1229_p10), [#allocation10], 4294967168 }
 0x4ad PF: > { %p848_p4 = scmp.ge.s32.totalorder %s1128_s20, 2  ;;  %s671_s29 = sand.u32 1, %s1108_s15  }
 0x4ae   : > { %s672_s27 = scalar_lea.sflag [#allocation4], %s671_s29 }
 0x4af   : > { %p838_p6 = pnand %p848_p4, %p1207_p5 }
 0x4b1   : > { %p839_p8 = pneg %p838_p6 }
 0x4b3   : > { %1103 = dma.done.wait (%p839_p8), %s672_s27, 1024  }
 0x4b4   : > { %1105 = vsyncadd (%p839_p8), %s672_s27, 4294966272  ;;  %s23_s20 = sadd.s32 1, %s1128_s20   ;;  %s1527_s15 = smov %s1112_s16 }
 0x4b5   : > { %p20_p0 = scmp.ge.s32.totalorder %s23_s20, 6   ;;  %s1528_s16 = smov %s1116_s17 }
 0x4b6   : > { %s1529_s17 = smov %s1252_s5  ;;  %s1530_s18 = smov %s1124_s19 }
 0x4b7   : > { %s1531_s19 = smov %s1533_s14  ;;  %22 = sbr.rel (!%p20_p0) target bundleno = 11 (0xb), region = 113 }
 0x4bc   :  { %678 = vsyncpa [#allocation3], 1 }
 0x4bd   :  { %680 = vsyncpa [#allocation3 + $0x1], 1 }
 0x4be   :  { %681 = vsyncpa [#allocation6], 1 }
 0x4bf   :  { %682 = vsyncpa [#allocation4], 1 }
 0x4c0   :  { %684 = vsyncpa [#allocation4 + $0x1], 1 }
 0x4c1   :  { %685 = vsyncpa [#allocation10], 1 }

</bundles_post_ra>
